<compile_context>
chip_gen: v5e
topology: v5e:2x2
jax: 0.10.0
libtpu: 0.0.40
codegen_flags: <defaults>
</compile_context>

<pallas_src>
import functools

import jax
import jax.numpy as jnp
from jax.experimental import pallas as pl
from jax.experimental.pallas import tpu as pltpu

BG_LABEL = 400
IOU_THRESH = 0.6
POSITIVE_FRACTION = 0.25
_LANE = 128


def _assign_body(gt_ref, prop_ref, idx_ref, topk_ref, iou_ref, *, k, n_real_cols):
    gt = gt_ref[...]          # (1, M, 8)  [cx, cy, w, h, valid, 0, 0, 0]
    pr = prop_ref[...]        # (1, 4, N)  rows = cx, cy, w, h
    _, M, _ = gt.shape
    N = pr.shape[2]

    gcx, gcy = gt[:, :, 0:1], gt[:, :, 1:2]
    gw, gh = gt[:, :, 2:3], gt[:, :, 3:4]
    vmask = gt[:, :, 4:5] > 0.5                          # (1, M, 1)
    gx0, gx1 = gcx - 0.5 * gw, gcx + 0.5 * gw
    gy0, gy1 = gcy - 0.5 * gh, gcy + 0.5 * gh

    pcx, pcy = pr[:, 0:1, :], pr[:, 1:2, :]
    pw, ph = pr[:, 2:3, :], pr[:, 3:4, :]
    px0, px1 = pcx - 0.5 * pw, pcx + 0.5 * pw
    py0, py1 = pcy - 0.5 * ph, pcy + 0.5 * ph

    # pairwise IoU: GT along sublanes (M), proposals along lanes (N)
    area_g = (gx1 - gx0) * (gy1 - gy0)                   # (1, M, 1)
    area_p = (px1 - px0) * (py1 - py0)                   # (1, 1, N)
    iw = jnp.maximum(jnp.minimum(gx1, px1) - jnp.maximum(gx0, px0), 0.0)
    ih = jnp.maximum(jnp.minimum(gy1, py1) - jnp.maximum(gy0, py0), 0.0)
    inter = iw * ih                                      # (1, M, N)
    union = jnp.maximum(area_g + area_p - inter, 1e-9)   # avoid 0/0 -> NaN
    inv = pl.reciprocal(union, approx=False)             # exact: threshold-safe

    # small broadcast iotas only (no full (M, N) index tensors)
    row = jax.lax.broadcasted_iota(jnp.int32, (1, M, 1), 1)
    col = jax.lax.broadcasted_iota(jnp.int32, (1, 1, N), 2)
    if n_real_cols != N:                                 # padded proposal columns
        mask = vmask & (col < n_real_cols)
    else:
        mask = vmask                                     # padded GT rows only

    # packed (value, index) keys: one XLU reduction per argmax / top-k step
    bits_m = max((M - 1).bit_length(), 1)
    bits_n = max((N - 1).bit_length(), 1)
    mp, np_ = 1 << bits_m, 1 << bits_n
    scale = float(1 << (30 - max(bits_m, bits_n)))
    q_thresh = int(IOU_THRESH * scale)

    if iou_ref is not None:
        iou = jnp.where(mask, inter * inv, -1.0)         # exact IoU, masked
        iou_ref[...] = iou
        q = (iou * scale).astype(jnp.int32)
    else:
        # fused mask + quantize; the unscaled IoU tensor is never materialized
        q = jnp.where(mask, inter * (inv * scale), -scale).astype(jnp.int32)

    # Matcher(thresholds=[0.6], labels=[0,1], allow_low_quality_matches=True)
    # best GT per proposal: one cross-sublane max of a packed key
    ckey = q * mp + (mp - 1 - row)
    ckmax = jnp.max(ckey, axis=1, keepdims=True)         # (1, 1, N)
    best_idx = (mp - 1) - (ckmax & (mp - 1))             # argmax row (first on ties)
    best_q = ckmax >> bits_m                             # quantized best value

    # per-GT best proposal (also iteration 0 of the top-k loop below)
    rkey = q * np_ + (np_ - 1 - col)
    rkmax = jnp.max(rkey, axis=2, keepdims=True)         # (1, M, 1)
    gt_best_q = rkmax >> bits_n
    low_q = jnp.max(jnp.where((q == gt_best_q) & vmask, 1, 0),
                    axis=1, keepdims=True) > 0           # (1, 1, N)
    labels = ((best_q >= q_thresh) | low_q).astype(jnp.int32)

    idx_ref[:, 0:1, :] = best_idx
    idx_ref[:, 1:2, :] = labels

    # per-GT top-k proposal indices by IoU; each pick is stored directly into
    # the small (M, 128) output lane slice (no full-size accumulation tensor).
    # For fully padded GT rows the picked columns are arbitrary — callers mask
    # them via the validity mask, so this is benign.
    topk_ref[...] = jnp.zeros_like(topk_ref)
    neg = jnp.int32(-(2 ** 31) + 1)
    work = rkey
    for kk in range(k):
        if kk > 0:
            rkmax = jnp.max(work, axis=2, keepdims=True)
        cur_idx = (np_ - 1) - (rkmax & (np_ - 1))        # (1, M, 1)
        topk_ref[:, :, kk:kk + 1] = cur_idx
        if kk + 1 < k:
            work = jnp.where(col == cur_idx, neg, work)


def _kernel_no_iou(gt_ref, prop_ref, idx_ref, topk_ref, *, k, n_real_cols):
    _assign_body(gt_ref, prop_ref, idx_ref, topk_ref, None,
                 k=k, n_real_cols=n_real_cols)


def _kernel_with_iou(gt_ref, prop_ref, idx_ref, topk_ref, iou_ref, *, k, n_real_cols):
    _assign_body(gt_ref, prop_ref, idx_ref, topk_ref, iou_ref,
                 k=k, n_real_cols=n_real_cols)


def iou_matcher_topk(gt_boxes, gt_valid, prop_boxes, k=4, return_iou=False):
    """Pallas hot path: pairwise IoU + Matcher + per-GT top-k for the batch."""
    B, M, _ = gt_boxes.shape
    N = prop_boxes.shape[1]
    n_pad = pl.cdiv(N, _LANE) * _LANE

    # merged GT slab (one DMA): [cx, cy, w, h, valid, 0, 0, 0]
    gt = gt_boxes.astype(jnp.float32)
    valid = gt_valid.astype(jnp.float32)[..., None]
    gt_slab = jnp.concatenate(
        [gt, valid, jnp.zeros((B, M, 3), jnp.float32)], axis=-1)      # (B, M, 8)

    props = prop_boxes.astype(jnp.float32)
    if n_pad != N:
        props = jnp.pad(props, ((0, 0), (0, n_pad - N), (0, 0)))
    prop_slab = jnp.transpose(props, (0, 2, 1))                       # (B, 4, n_pad)

    out_shapes = [jax.ShapeDtypeStruct((B, 2, n_pad), jnp.int32),
                  jax.ShapeDtypeStruct((B, M, _LANE), jnp.int32)]
    out_specs = [pl.BlockSpec((1, 2, n_pad), lambda i: (i, 0, 0)),
                 pl.BlockSpec((1, M, _LANE), lambda i: (i, 0, 0))]
    if return_iou:
        out_shapes.append(jax.ShapeDtypeStruct((B, M, n_pad), jnp.float32))
        out_specs.append(pl.BlockSpec((1, M, n_pad), lambda i: (i, 0, 0)))
        kernel = functools.partial(_kernel_with_iou, k=k, n_real_cols=N)
    else:
        kernel = functools.partial(_kernel_no_iou, k=k, n_real_cols=N)

    # Generation-agnostic VMEM budget for one bb=1 step: double-buffered I/O
    # blocks + ~14 live (M, n_pad) f32/i32 temporaries, clamped to [32, 96] MiB.
    io_bytes = 4 * (M * 8 + 4 * n_pad + 2 * n_pad + M * _LANE
                    + (M * n_pad if return_iou else 0))
    tmp_bytes = 14 * M * n_pad * 4
    vmem_limit = int(min(96 * 2 ** 20,
                         max(32 * 2 ** 20, 2 * io_bytes + tmp_bytes + (1 << 20))))

    outs = pl.pallas_call(
        kernel,
        out_shape=tuple(out_shapes),
        grid_spec=pltpu.PrefetchScalarGridSpec(
            num_scalar_prefetch=0,
            grid=(B,),
            in_specs=[
                pl.BlockSpec((1, M, 8), lambda i: (i, 0, 0)),
                pl.BlockSpec((1, 4, n_pad), lambda i: (i, 0, 0)),
            ],
            out_specs=tuple(out_specs),
        ),
        compiler_params=pltpu.CompilerParams(
            dimension_semantics=("parallel",),
            vmem_limit_bytes=vmem_limit),
    )(gt_slab, prop_slab)

    midx = outs[0][:, 0, :N]
    mlbl = outs[0][:, 1, :N]
    topk = outs[1][:, :, :k]
    if return_iou:
        return midx, mlbl, topk, outs[2][:, :, :N]
    return midx, mlbl, topk


def _sample_and_postprocess(matched_idxs, matched_labels, topk_idx, key, *,
                            num_queries, k):
    """_sample_proposals + sample_topk_per_gt with fixed (padded) shapes.

    Class labels live in [0, num_classes) (never -1 and never BG_LABEL), so a
    proposal is foreground iff matched_labels == 1.  Returns flat
    (pos_pr_inds, pos_gt_inds, valid_mask) of length M*k.
    """
    n = num_queries
    m, kk = topk_idx.shape
    pos_mask = matched_labels == 1
    num_pos_cap = int(n * POSITIVE_FRACTION)

    # TODO(synk): subsample_labels uses torch.randperm over a dynamic-size
    # positive set; emulated with fixed-size random-score top-k (a uniform
    # random subset of min(#pos, N*0.25) positives, padded slots masked out).
    rand = jax.random.uniform(key, (n,))
    score = jnp.where(pos_mask, rand, -1.0)
    _, sel = jax.lax.top_k(score, num_pos_cap)
    n_pos = jnp.sum(pos_mask.astype(jnp.int32))
    sel_valid = jnp.arange(num_pos_cap) < jnp.minimum(n_pos, num_pos_cap)
    pos_gt = matched_idxs[sel]                                  # (num_pos_cap,)

    # sample_topk_per_gt: per GT g present among the sampled positives, keep
    # the first min(count_g, k) of g's top-k proposals (top-k over ALL
    # proposals, exactly as in the reference), emitted in ascending-g order.
    gt_ids = jnp.arange(m)
    counts = jnp.sum(
        jnp.where(sel_valid[None, :] & (pos_gt[None, :] == gt_ids[:, None]),
                  1, 0), axis=1)                                # (M,)
    take = jnp.minimum(counts, kk)
    valid = jnp.arange(kk)[None, :] < take[:, None]             # (M, k)
    gt_out = jnp.broadcast_to(gt_ids[:, None], (m, kk))
    return topk_idx.reshape(-1), gt_out.reshape(-1), valid.reshape(-1)


def stage2_assigner_forward(gt_boxes, gt_valid, gt_labels, init_reference, key,
                            num_queries, k=4, return_cost_matrix=False):
    """JAX/Pallas equivalent of Stage2Assigner.forward.

    gt_labels is carried for interface fidelity; since class ids live in
    [0, num_classes) (never -1 / bg), positivity reduces to matched_labels==1.
    Returns per-image fixed-size (pos_pr_inds, pos_gt_inds, valid_mask).
    """
    del gt_labels
    B = gt_boxes.shape[0]
    res = iou_matcher_topk(gt_boxes, gt_valid, init_reference, k=k,
                           return_iou=return_cost_matrix)
    midx, mlbl, topk = res[0], res[1], res[2]
    keys = jax.random.split(key, B)
    post = jax.vmap(functools.partial(_sample_and_postprocess,
                                      num_queries=num_queries, k=k))
    pr_all, gt_all, valid_all = post(midx, mlbl, topk, keys)
    indices = [(pr_all[b], gt_all[b], valid_all[b]) for b in range(B)]
    if return_cost_matrix:
        return indices, res[3]
    return indices


if __name__ == "__main__":
    B, M, N, K = 2, 8, 128, 4          # batch, padded #GT, num_queries, max_k
    key = jax.random.PRNGKey(0)
    k_gt, k_gt2, k_prop, k_prop2, k_jit, k_lbl, k_samp = jax.random.split(key, 7)

    num_gt = jnp.array([5, 3], dtype=jnp.int32)
    gt_valid = jnp.arange(M)[None, :] < num_gt[:, None]            # (B, M) bool

    gt_cxcy = jax.random.uniform(k_gt, (B, M, 2), minval=0.2, maxval=0.8)
    gt_wh = jax.random.uniform(k_gt2, (B, M, 2), minval=0.1, maxval=0.3)
    gt_boxes = jnp.concatenate([gt_cxcy, gt_wh], axis=-1)          # (B, M, 4) cxcywh

    prop_cxcy = jax.random.uniform(k_prop, (B, N, 2), minval=0.1, maxval=0.9)
    prop_wh = jax.random.uniform(k_prop2, (B, N, 2), minval=0.05, maxval=0.35)
    props = jnp.concatenate([prop_cxcy, prop_wh], axis=-1)         # (B, N, 4) cxcywh
    # make the first M proposals jittered copies of the GT boxes (some IoU > 0.6)
    jitter = 0.02 * jax.random.normal(k_jit, (B, M, 4))
    jittered = gt_boxes + jitter
    jittered = jittered.at[..., 2:].set(jnp.clip(jittered[..., 2:], 0.02, None))
    props = props.at[:, :M, :].set(jittered)

    gt_labels = jax.random.randint(k_lbl, (B, M), 0, 80)

    fwd = jax.jit(functools.partial(stage2_assigner_forward,
                                    num_queries=N, k=K,
                                    return_cost_matrix=True))
    indices, iou = fwd(gt_boxes, gt_valid, gt_labels, props, k_samp)

    jax.block_until_ready(iou)
    for pr_inds, gt_inds, valid_mask in indices:
        jax.block_until_ready((pr_inds, gt_inds, valid_mask))
    print("KERNEL_OK")
</pallas_src>

<mosaic_0001>
module attributes {stable_mosaic.version = 11 : i64} {
  func.func @_kernel_with_iou(%arg0: i32, %arg1: memref<1x8x8xf32, #tpu.memory_space<vmem>>, %arg2: memref<1x4x128xf32, #tpu.memory_space<vmem>>, %arg3: memref<1x2x128xi32, #tpu.memory_space<vmem>>, %arg4: memref<1x8x128xi32, #tpu.memory_space<vmem>>, %arg5: memref<1x8x128xf32, #tpu.memory_space<vmem>>) attributes {dimension_semantics = [#tpu.dimension_semantics<parallel>], iteration_bounds = array<i64: 2>, scalar_prefetch = 0 : i64, scratch_operands = 0 : i64, tpu.core_type = #tpu.core_type<tc>, window_params = [{transform_indices = @transform_0, window_bounds = array<i64: 1, 8, 8>}, {transform_indices = @transform_1, window_bounds = array<i64: 1, 4, 128>}, {transform_indices = @transform_2, window_bounds = array<i64: 1, 2, 128>}, {transform_indices = @transform_3, window_bounds = array<i64: 1, 8, 128>}, {transform_indices = @transform_4, window_bounds = array<i64: 1, 8, 128>}]} {
    %c0 = arith.constant 0 : index
    %c0_0 = arith.constant 0 : index
    %c0_1 = arith.constant 0 : index
    %0 = vector.load %arg1[%c0, %c0_0, %c0_1] : memref<1x8x8xf32, #tpu.memory_space<vmem>>, vector<1x8x8xf32>
    %c0_2 = arith.constant 0 : index
    %c0_3 = arith.constant 0 : index
    %c0_4 = arith.constant 0 : index
    %1 = vector.load %arg2[%c0_2, %c0_3, %c0_4] : memref<1x4x128xf32, #tpu.memory_space<vmem>>, vector<1x4x128xf32>
    %2 = vector.extract_strided_slice %0 {offsets = [0, 0, 0], sizes = [1, 8, 1], strides = [1, 1, 1]} : vector<1x8x8xf32> to vector<1x8x1xf32>
    %3 = vector.extract_strided_slice %0 {offsets = [0, 0, 1], sizes = [1, 8, 1], strides = [1, 1, 1]} : vector<1x8x8xf32> to vector<1x8x1xf32>
    %4 = vector.extract_strided_slice %0 {offsets = [0, 0, 2], sizes = [1, 8, 1], strides = [1, 1, 1]} : vector<1x8x8xf32> to vector<1x8x1xf32>
    %5 = vector.extract_strided_slice %0 {offsets = [0, 0, 3], sizes = [1, 8, 1], strides = [1, 1, 1]} : vector<1x8x8xf32> to vector<1x8x1xf32>
    %6 = vector.extract_strided_slice %0 {offsets = [0, 0, 4], sizes = [1, 8, 1], strides = [1, 1, 1]} : vector<1x8x8xf32> to vector<1x8x1xf32>
    %cst = arith.constant 5.000000e-01 : f32
    %7 = vector.broadcast %cst : f32 to vector<1x8x1xf32>
    %8 = arith.cmpf ogt, %6, %7 : vector<1x8x1xf32>
    %cst_5 = arith.constant 5.000000e-01 : f32
    %9 = vector.broadcast %cst_5 : f32 to vector<1x8x1xf32>
    %10 = arith.mulf %9, %4 : vector<1x8x1xf32>
    %11 = arith.subf %2, %10 : vector<1x8x1xf32>
    %cst_6 = arith.constant 5.000000e-01 : f32
    %12 = vector.broadcast %cst_6 : f32 to vector<1x8x1xf32>
    %13 = arith.mulf %12, %4 : vector<1x8x1xf32>
    %14 = arith.addf %2, %13 : vector<1x8x1xf32>
    %cst_7 = arith.constant 5.000000e-01 : f32
    %15 = vector.broadcast %cst_7 : f32 to vector<1x8x1xf32>
    %16 = arith.mulf %15, %5 : vector<1x8x1xf32>
    %17 = arith.subf %3, %16 : vector<1x8x1xf32>
    %cst_8 = arith.constant 5.000000e-01 : f32
    %18 = vector.broadcast %cst_8 : f32 to vector<1x8x1xf32>
    %19 = arith.mulf %18, %5 : vector<1x8x1xf32>
    %20 = arith.addf %3, %19 : vector<1x8x1xf32>
    %21 = vector.extract_strided_slice %1 {offsets = [0, 0, 0], sizes = [1, 1, 128], strides = [1, 1, 1]} : vector<1x4x128xf32> to vector<1x1x128xf32>
    %22 = vector.extract_strided_slice %1 {offsets = [0, 1, 0], sizes = [1, 1, 128], strides = [1, 1, 1]} : vector<1x4x128xf32> to vector<1x1x128xf32>
    %23 = vector.extract_strided_slice %1 {offsets = [0, 2, 0], sizes = [1, 1, 128], strides = [1, 1, 1]} : vector<1x4x128xf32> to vector<1x1x128xf32>
    %24 = vector.extract_strided_slice %1 {offsets = [0, 3, 0], sizes = [1, 1, 128], strides = [1, 1, 1]} : vector<1x4x128xf32> to vector<1x1x128xf32>
    %cst_9 = arith.constant 5.000000e-01 : f32
    %25 = vector.broadcast %cst_9 : f32 to vector<1x1x128xf32>
    %26 = arith.mulf %25, %23 : vector<1x1x128xf32>
    %27 = arith.subf %21, %26 : vector<1x1x128xf32>
    %cst_10 = arith.constant 5.000000e-01 : f32
    %28 = vector.broadcast %cst_10 : f32 to vector<1x1x128xf32>
    %29 = arith.mulf %28, %23 : vector<1x1x128xf32>
    %30 = arith.addf %21, %29 : vector<1x1x128xf32>
    %cst_11 = arith.constant 5.000000e-01 : f32
    %31 = vector.broadcast %cst_11 : f32 to vector<1x1x128xf32>
    %32 = arith.mulf %31, %24 : vector<1x1x128xf32>
    %33 = arith.subf %22, %32 : vector<1x1x128xf32>
    %cst_12 = arith.constant 5.000000e-01 : f32
    %34 = vector.broadcast %cst_12 : f32 to vector<1x1x128xf32>
    %35 = arith.mulf %34, %24 : vector<1x1x128xf32>
    %36 = arith.addf %22, %35 : vector<1x1x128xf32>
    %37 = arith.subf %14, %11 : vector<1x8x1xf32>
    %38 = arith.subf %20, %17 : vector<1x8x1xf32>
    %39 = arith.mulf %37, %38 : vector<1x8x1xf32>
    %40 = arith.subf %30, %27 : vector<1x1x128xf32>
    %41 = arith.subf %36, %33 : vector<1x1x128xf32>
    %42 = arith.mulf %40, %41 : vector<1x1x128xf32>
    %43 = vector.broadcast %14 : vector<1x8x1xf32> to vector<1x8x128xf32>
    %44 = vector.broadcast %30 : vector<1x1x128xf32> to vector<1x8x128xf32>
    %45 = arith.minimumf %43, %44 : vector<1x8x128xf32>
    %46 = vector.broadcast %11 : vector<1x8x1xf32> to vector<1x8x128xf32>
    %47 = vector.broadcast %27 : vector<1x1x128xf32> to vector<1x8x128xf32>
    %48 = arith.maximumf %46, %47 : vector<1x8x128xf32>
    %49 = arith.subf %45, %48 : vector<1x8x128xf32>
    %cst_13 = arith.constant 0.000000e+00 : f32
    %50 = vector.broadcast %cst_13 : f32 to vector<1x8x128xf32>
    %51 = arith.maximumf %49, %50 : vector<1x8x128xf32>
    %52 = vector.broadcast %20 : vector<1x8x1xf32> to vector<1x8x128xf32>
    %53 = vector.broadcast %36 : vector<1x1x128xf32> to vector<1x8x128xf32>
    %54 = arith.minimumf %52, %53 : vector<1x8x128xf32>
    %55 = vector.broadcast %17 : vector<1x8x1xf32> to vector<1x8x128xf32>
    %56 = vector.broadcast %33 : vector<1x1x128xf32> to vector<1x8x128xf32>
    %57 = arith.maximumf %55, %56 : vector<1x8x128xf32>
    %58 = arith.subf %54, %57 : vector<1x8x128xf32>
    %cst_14 = arith.constant 0.000000e+00 : f32
    %59 = vector.broadcast %cst_14 : f32 to vector<1x8x128xf32>
    %60 = arith.maximumf %58, %59 : vector<1x8x128xf32>
    %61 = arith.mulf %51, %60 : vector<1x8x128xf32>
    %62 = vector.broadcast %39 : vector<1x8x1xf32> to vector<1x8x128xf32>
    %63 = vector.broadcast %42 : vector<1x1x128xf32> to vector<1x8x128xf32>
    %64 = arith.addf %62, %63 : vector<1x8x128xf32>
    %65 = arith.subf %64, %61 : vector<1x8x128xf32>
    %cst_15 = arith.constant 9.99999971E-10 : f32
    %66 = vector.broadcast %cst_15 : f32 to vector<1x8x128xf32>
    %67 = arith.maximumf %65, %66 : vector<1x8x128xf32>
    %68 = tpu.reciprocal %67 : vector<1x8x128xf32> -> vector<1x8x128xf32>
    %69 = tpu.iota {dimensions = array<i32: 1>} : vector<1x8x1xi32>
    %70 = tpu.iota {dimensions = array<i32: 2>} : vector<1x1x128xi32>
    %71 = arith.mulf %61, %68 : vector<1x8x128xf32>
    %cst_16 = arith.constant -1.000000e+00 : f32
    %72 = vector.shape_cast %8 : vector<1x8x1xi1> to vector<1x8x1xi1>
    %73 = vector.broadcast %72 : vector<1x8x1xi1> to vector<1x8x128xi1>
    %74 = vector.broadcast %cst_16 : f32 to vector<1x8x128xf32>
    %75 = arith.select %73, %71, %74 : vector<1x8x128xi1>, vector<1x8x128xf32>
    %c0_17 = arith.constant 0 : index
    %c0_18 = arith.constant 0 : index
    %c0_19 = arith.constant 0 : index
    %76 = vector.load %arg5[%c0_17, %c0_18, %c0_19] : memref<1x8x128xf32, #tpu.memory_space<vmem>>, vector<1x8x128xf32>
    tpu.vector_store %arg5[%c0_17, %c0_18, %c0_19], %75 {strides = array<i32>} : memref<1x8x128xf32, #tpu.memory_space<vmem>>, vector<1x8x128xf32>,
    %cst_20 = arith.constant 0x4B000000 : f32
    %77 = vector.broadcast %cst_20 : f32 to vector<1x8x128xf32>
    %78 = arith.mulf %75, %77 : vector<1x8x128xf32>
    %79 = arith.fptosi %78 : vector<1x8x128xf32> to vector<1x8x128xi32>
    %c8_i32 = arith.constant 8 : i32
    %80 = vector.broadcast %c8_i32 : i32 to vector<1x8x128xi32>
    %81 = arith.muli %79, %80 : vector<1x8x128xi32>
    %c7_i32 = arith.constant 7 : i32
    %82 = vector.broadcast %c7_i32 : i32 to vector<1x8x1xi32>
    %83 = arith.subi %82, %69 : vector<1x8x1xi32>
    %84 = vector.broadcast %83 : vector<1x8x1xi32> to vector<1x8x128xi32>
    %85 = arith.addi %81, %84 : vector<1x8x128xi32>
    %cst_21 = arith.constant dense<-2147483648> : vector<1x128xi32>
    %86 = vector.multi_reduction <maxsi>, %85, %cst_21 [1] : vector<1x8x128xi32> to vector<1x128xi32>
    %87 = vector.shape_cast %86 : vector<1x128xi32> to vector<1x1x128xi32>
    %c7_i32_22 = arith.constant 7 : i32
    %88 = vector.broadcast %c7_i32_22 : i32 to vector<1x1x128xi32>
    %89 = arith.andi %87, %88 : vector<1x1x128xi32>
    %c7_i32_23 = arith.constant 7 : i32
    %90 = vector.broadcast %c7_i32_23 : i32 to vector<1x1x128xi32>
    %91 = arith.subi %90, %89 : vector<1x1x128xi32>
    %c3_i32 = arith.constant 3 : i32
    %92 = vector.broadcast %c3_i32 : i32 to vector<1x1x128xi32>
    %93 = arith.shrsi %87, %92 : vector<1x1x128xi32>
    %c128_i32 = arith.constant 128 : i32
    %94 = vector.broadcast %c128_i32 : i32 to vector<1x8x128xi32>
    %95 = arith.muli %79, %94 : vector<1x8x128xi32>
    %c127_i32 = arith.constant 127 : i32
    %96 = vector.broadcast %c127_i32 : i32 to vector<1x1x128xi32>
    %97 = arith.subi %96, %70 : vector<1x1x128xi32>
    %98 = vector.broadcast %97 : vector<1x1x128xi32> to vector<1x8x128xi32>
    %99 = arith.addi %95, %98 : vector<1x8x128xi32>
    %cst_24 = arith.constant dense<-2147483648> : vector<1x8xi32>
    %100 = vector.multi_reduction <maxsi>, %99, %cst_24 [2] : vector<1x8x128xi32> to vector<1x8xi32>
    %101 = vector.shape_cast %100 : vector<1x8xi32> to vector<1x8x1xi32>
    %c7_i32_25 = arith.constant 7 : i32
    %102 = vector.broadcast %c7_i32_25 : i32 to vector<1x8x1xi32>
    %103 = arith.shrsi %101, %102 : vector<1x8x1xi32>
    %104 = vector.broadcast %103 : vector<1x8x1xi32> to vector<1x8x128xi32>
    %105 = arith.cmpi eq, %79, %104 : vector<1x8x128xi32>
    %106 = vector.broadcast %8 : vector<1x8x1xi1> to vector<1x8x128xi1>
    %107 = arith.andi %105, %106 : vector<1x8x128xi1>
    %c1_i32 = arith.constant 1 : i32
    %c0_i32 = arith.constant 0 : i32
    %108 = vector.broadcast %c1_i32 : i32 to vector<1x8x128xi32>
    %109 = vector.broadcast %c0_i32 : i32 to vector<1x8x128xi32>
    %110 = arith.select %107, %108, %109 : vector<1x8x128xi1>, vector<1x8x128xi32>
    %cst_26 = arith.constant dense<-2147483648> : vector<1x128xi32>
    %111 = vector.multi_reduction <maxsi>, %110, %cst_26 [1] : vector<1x8x128xi32> to vector<1x128xi32>
    %112 = vector.shape_cast %111 : vector<1x128xi32> to vector<1x1x128xi32>
    %c0_i32_27 = arith.constant 0 : i32
    %113 = vector.broadcast %c0_i32_27 : i32 to vector<1x1x128xi32>
    %114 = arith.cmpi sgt, %112, %113 : vector<1x1x128xi32>
    %c5033164_i32 = arith.constant 5033164 : i32
    %115 = vector.broadcast %c5033164_i32 : i32 to vector<1x1x128xi32>
    %116 = arith.cmpi sge, %93, %115 : vector<1x1x128xi32>
    %117 = arith.ori %116, %114 : vector<1x1x128xi1>
    %118 = arith.extui %117 : vector<1x1x128xi1> to vector<1x1x128xi32>
    %c0_28 = arith.constant 0 : index
    %c0_29 = arith.constant 0 : index
    %c0_30 = arith.constant 0 : index
    %119 = vector.load %arg3[%c0_28, %c0_29, %c0_30] : memref<1x2x128xi32, #tpu.memory_space<vmem>>, vector<1x1x128xi32>
    tpu.vector_store %arg3[%c0_28, %c0_29, %c0_30], %91 {strides = array<i32>} : memref<1x2x128xi32, #tpu.memory_space<vmem>>, vector<1x1x128xi32>,
    %c0_31 = arith.constant 0 : index
    %c1 = arith.constant 1 : index
    %c0_32 = arith.constant 0 : index
    %120 = vector.load %arg3[%c0_31, %c1, %c0_32] : memref<1x2x128xi32, #tpu.memory_space<vmem>>, vector<1x1x128xi32>
    tpu.vector_store %arg3[%c0_31, %c1, %c0_32], %118 {strides = array<i32>} : memref<1x2x128xi32, #tpu.memory_space<vmem>>, vector<1x1x128xi32>,
    %c0_i32_33 = arith.constant 0 : i32
    %121 = vector.broadcast %c0_i32_33 : i32 to vector<1x8x128xi32>
    %c0_34 = arith.constant 0 : index
    %c0_35 = arith.constant 0 : index
    %c0_36 = arith.constant 0 : index
    %122 = vector.load %arg4[%c0_34, %c0_35, %c0_36] : memref<1x8x128xi32, #tpu.memory_space<vmem>>, vector<1x8x128xi32>
    tpu.vector_store %arg4[%c0_34, %c0_35, %c0_36], %121 {strides = array<i32>} : memref<1x8x128xi32, #tpu.memory_space<vmem>>, vector<1x8x128xi32>,
    %c127_i32_37 = arith.constant 127 : i32
    %123 = vector.broadcast %c127_i32_37 : i32 to vector<1x8x1xi32>
    %124 = arith.andi %101, %123 : vector<1x8x1xi32>
    %c127_i32_38 = arith.constant 127 : i32
    %125 = vector.broadcast %c127_i32_38 : i32 to vector<1x8x1xi32>
    %126 = arith.subi %125, %124 : vector<1x8x1xi32>
    %c0_39 = arith.constant 0 : index
    %c0_40 = arith.constant 0 : index
    %c0_41 = arith.constant 0 : index
    %127 = vector.load %arg4[%c0_39, %c0_40, %c0_41] : memref<1x8x128xi32, #tpu.memory_space<vmem>>, vector<1x8x1xi32>
    tpu.vector_store %arg4[%c0_39, %c0_40, %c0_41], %126 {strides = array<i32>} : memref<1x8x128xi32, #tpu.memory_space<vmem>>, vector<1x8x1xi32>,
    %128 = vector.broadcast %70 : vector<1x1x128xi32> to vector<1x8x128xi32>
    %129 = vector.broadcast %126 : vector<1x8x1xi32> to vector<1x8x128xi32>
    %130 = arith.cmpi eq, %128, %129 : vector<1x8x128xi32>
    %c-2147483647_i32 = arith.constant -2147483647 : i32
    %131 = vector.broadcast %c-2147483647_i32 : i32 to vector<1x8x128xi32>
    %132 = arith.select %130, %131, %99 : vector<1x8x128xi1>, vector<1x8x128xi32>
    %cst_42 = arith.constant dense<-2147483648> : vector<1x8xi32>
    %133 = vector.multi_reduction <maxsi>, %132, %cst_42 [2] : vector<1x8x128xi32> to vector<1x8xi32>
    %134 = vector.shape_cast %133 : vector<1x8xi32> to vector<1x8x1xi32>
    %c127_i32_43 = arith.constant 127 : i32
    %135 = vector.broadcast %c127_i32_43 : i32 to vector<1x8x1xi32>
    %136 = arith.andi %134, %135 : vector<1x8x1xi32>
    %c127_i32_44 = arith.constant 127 : i32
    %137 = vector.broadcast %c127_i32_44 : i32 to vector<1x8x1xi32>
    %138 = arith.subi %137, %136 : vector<1x8x1xi32>
    %c0_45 = arith.constant 0 : index
    %c0_46 = arith.constant 0 : index
    %c1_47 = arith.constant 1 : index
    %139 = vector.load %arg4[%c0_45, %c0_46, %c1_47] : memref<1x8x128xi32, #tpu.memory_space<vmem>>, vector<1x8x1xi32>
    tpu.vector_store %arg4[%c0_45, %c0_46, %c1_47], %138 {strides = array<i32>} : memref<1x8x128xi32, #tpu.memory_space<vmem>>, vector<1x8x1xi32>,
    %140 = vector.broadcast %70 : vector<1x1x128xi32> to vector<1x8x128xi32>
    %141 = vector.broadcast %138 : vector<1x8x1xi32> to vector<1x8x128xi32>
    %142 = arith.cmpi eq, %140, %141 : vector<1x8x128xi32>
    %c-2147483647_i32_48 = arith.constant -2147483647 : i32
    %143 = vector.broadcast %c-2147483647_i32_48 : i32 to vector<1x8x128xi32>
    %144 = arith.select %142, %143, %132 : vector<1x8x128xi1>, vector<1x8x128xi32>
    %cst_49 = arith.constant dense<-2147483648> : vector<1x8xi32>
    %145 = vector.multi_reduction <maxsi>, %144, %cst_49 [2] : vector<1x8x128xi32> to vector<1x8xi32>
    %146 = vector.shape_cast %145 : vector<1x8xi32> to vector<1x8x1xi32>
    %c127_i32_50 = arith.constant 127 : i32
    %147 = vector.broadcast %c127_i32_50 : i32 to vector<1x8x1xi32>
    %148 = arith.andi %146, %147 : vector<1x8x1xi32>
    %c127_i32_51 = arith.constant 127 : i32
    %149 = vector.broadcast %c127_i32_51 : i32 to vector<1x8x1xi32>
    %150 = arith.subi %149, %148 : vector<1x8x1xi32>
    %c0_52 = arith.constant 0 : index
    %c0_53 = arith.constant 0 : index
    %c2 = arith.constant 2 : index
    %151 = vector.load %arg4[%c0_52, %c0_53, %c2] : memref<1x8x128xi32, #tpu.memory_space<vmem>>, vector<1x8x1xi32>
    tpu.vector_store %arg4[%c0_52, %c0_53, %c2], %150 {strides = array<i32>} : memref<1x8x128xi32, #tpu.memory_space<vmem>>, vector<1x8x1xi32>,
    %152 = vector.broadcast %70 : vector<1x1x128xi32> to vector<1x8x128xi32>
    %153 = vector.broadcast %150 : vector<1x8x1xi32> to vector<1x8x128xi32>
    %154 = arith.cmpi eq, %152, %153 : vector<1x8x128xi32>
    %c-2147483647_i32_54 = arith.constant -2147483647 : i32
    %155 = vector.broadcast %c-2147483647_i32_54 : i32 to vector<1x8x128xi32>
    %156 = arith.select %154, %155, %144 : vector<1x8x128xi1>, vector<1x8x128xi32>
    %cst_55 = arith.constant dense<-2147483648> : vector<1x8xi32>
    %157 = vector.multi_reduction <maxsi>, %156, %cst_55 [2] : vector<1x8x128xi32> to vector<1x8xi32>
    %158 = vector.shape_cast %157 : vector<1x8xi32> to vector<1x8x1xi32>
    %c127_i32_56 = arith.constant 127 : i32
    %159 = vector.broadcast %c127_i32_56 : i32 to vector<1x8x1xi32>
    %160 = arith.andi %158, %159 : vector<1x8x1xi32>
    %c127_i32_57 = arith.constant 127 : i32
    %161 = vector.broadcast %c127_i32_57 : i32 to vector<1x8x1xi32>
    %162 = arith.subi %161, %160 : vector<1x8x1xi32>
    %c0_58 = arith.constant 0 : index
    %c0_59 = arith.constant 0 : index
    %c3 = arith.constant 3 : index
    %163 = vector.load %arg4[%c0_58, %c0_59, %c3] : memref<1x8x128xi32, #tpu.memory_space<vmem>>, vector<1x8x1xi32>
    tpu.vector_store %arg4[%c0_58, %c0_59, %c3], %162 {strides = array<i32>} : memref<1x8x128xi32, #tpu.memory_space<vmem>>, vector<1x8x1xi32>,
    return
  }
  func.func @transform_0(%arg0: i32) -> (i32, i32, i32) {
    %c0_i32 = arith.constant 0 : i32
    %c0_i32_0 = arith.constant 0 : i32
    %c0_i32_1 = arith.constant 0 : i32
    return %arg0, %c0_i32, %c0_i32_0 : i32, i32, i32
  }
  func.func @transform_1(%arg0: i32) -> (i32, i32, i32) {
    %c0_i32 = arith.constant 0 : i32
    %c0_i32_0 = arith.constant 0 : i32
    %c0_i32_1 = arith.constant 0 : i32
    return %arg0, %c0_i32, %c0_i32_0 : i32, i32, i32
  }
  func.func @transform_2(%arg0: i32) -> (i32, i32, i32) {
    %c0_i32 = arith.constant 0 : i32
    %c0_i32_0 = arith.constant 0 : i32
    %c0_i32_1 = arith.constant 0 : i32
    return %arg0, %c0_i32, %c0_i32_0 : i32, i32, i32
  }
  func.func @transform_3(%arg0: i32) -> (i32, i32, i32) {
    %c0_i32 = arith.constant 0 : i32
    %c0_i32_0 = arith.constant 0 : i32
    %c0_i32_1 = arith.constant 0 : i32
    return %arg0, %c0_i32, %c0_i32_0 : i32, i32, i32
  }
  func.func @transform_4(%arg0: i32) -> (i32, i32, i32) {
    %c0_i32 = arith.constant 0 : i32
    %c0_i32_0 = arith.constant 0 : i32
    %c0_i32_1 = arith.constant 0 : i32
    return %arg0, %c0_i32, %c0_i32_0 : i32, i32, i32
  }
}

</mosaic_0001>

<bundles_post_ra>
// kernel: squeeze.14
= control target key start
LH: loop header
LB: loop body
LE: loop exit
PB: predicated region body
PF: predicated region fallthrough
CT: control target
= control target key end

     0   :  { %s107_s10 = smov 28   ;;  %s108_s11 = smov 20   ;;  %s152_s0 = inlined_call_operand.vmem [shape: s32[1,8,4], index: 0, kind: input, shape index: {}]   ;;  %s153_s1 = inlined_call_operand.hbm [shape: s32[32], index: 1, kind: output, shape index: {}]  }
   0x1   :  { %v66_v0 = vld [vmem:[%s152_s0 + $0x7] sm:$0x1]   ;;  %v68_v1 = vld [vmem:[%s152_s0 + $0x5] sm:$0x1]   ;;  %v70_v2 = vld [vmem:[%s152_s0 + $0x3] sm:$0x1]  }
   0x2   :  { %8 = vrot.lane.b32.xlu0 %v66_v0, %s107_s10  ;;  %20 = vrot.lane.b32.xlu1 %v68_v1, %s108_s11  ;;  %s109_s14 = smov 12  }
   0x3   :  { %32 = vrot.lane.b32.xlu2 %v70_v2, %s109_s14 }
   0x4   :  { %2 = vsyncpa [#allocation1], 0  ;;  %v67_v3 = vld [vmem:[%s152_s0 + $0x6] sm:$0x1]   ;;  %v69_v4 = vld [vmem:[%s152_s0 + $0x4] sm:$0x1]  }
   0x5   :  { %v71_v5 = vld [vmem:[%s152_s0 + $0x2] sm:$0x1]   ;;  %s110_s21 = smov 24   ;;  %s111_s22 = smov 16   ;;  %v72_v6 = vld [vmem:[%s152_s0 + $0x1] sm:$0x1]  }
   0x6   :  { %s112_s23 = smov 8   ;;  %s113_s26 = smov 4   ;;  %v3_v7 = vld [vmem:[%s152_s0] sm:$0x1]   ;;  %vm4_vm0 = vcmask 31744   ;;  %vm10_vm1 = vcmask 261344  }
   0x7   :  { %5 = vst.msk [vmem:[#allocation2] sm:$0x1] %vm4_vm0, %v3_v7   ;;  %vm16_vm2 = vcmask 228544   ;;  %vm22_vm3 = vcmask 195744   ;;  %vm28_vm4 = vcmask 162944   ;;  %vm34_vm5 = vcmask 130144  }
   0x8   :  { %vm40_vm6 = vcmask 97344   ;;  %vm46_vm7 = vcmask 64544   ;;  %s114_s0 = smov [#allocation0]   ;;  %s59_s1 = sshll.u32 %s153_s1, 4  ;;  %s60_s1 = int_to_ptr.hbm [resolvable:$true] %s59_s1 }
   0x9   :  { %s57_s29 = sshll.u32 %s114_s0, 4  ;;  %s58_s29 = int_to_ptr.vmem [resolvable:$true] %s57_s29 }
   0xa   :  { %14 = vrot.lane.b32.xlu0 %v67_v3, %s110_s21  ;;  %26 = vrot.lane.b32.xlu1 %v69_v4, %s111_s22 }
   0xb   :  { %38 = vrot.lane.b32.xlu2 %v71_v5, %s112_s23 }
  0x12   :  { %44 = vrot.lane.b32.xlu0 %v72_v6, %s113_s26 }
  0x5d   :  { %v33_v8 = vpop.permute.xlu2 %32  }
  0x65   :  { %v39_v9 = vpop.permute.xlu2 %38  }
  0x74   :  { %v9_v10 = vpop.permute.xlu0 %8   ;;  %v21_v11 = vpop.permute.xlu1 %20  }
  0x75   :  { %11 = vst.msk [vmem:[#allocation2] sm:$0x1] %vm10_vm1, %v9_v10  }
  0x7c   :  { %v15_v12 = vpop.permute.xlu0 %14   ;;  %v27_v13 = vpop.permute.xlu1 %26  }
  0x7d   :  { %17 = vst.msk [vmem:[#allocation2] sm:$0x1] %vm16_vm2, %v15_v12  }
  0x7e   :  { %23 = vst.msk [vmem:[#allocation2] sm:$0x1] %vm22_vm3, %v21_v11  }
  0x7f   :  { %29 = vst.msk [vmem:[#allocation2] sm:$0x1] %vm28_vm4, %v27_v13  }
  0x80   :  { %35 = vst.msk [vmem:[#allocation2] sm:$0x1] %vm34_vm5, %v33_v8  }
  0x81   :  { %41 = vst.msk [vmem:[#allocation2] sm:$0x1] %vm40_vm6, %v39_v9  }
  0x84   :  { %v45_v14 = vpop.permute.xlu0 %44  }
  0x85   :  { %47 = vst.msk [vmem:[#allocation2] sm:$0x1] %vm46_vm7, %v45_v14  }
  0x8c   :  { %v50_v15 = vld [vmem:[#allocation2] sm:$0x1] }
  0x8d   :  { %53 = vst [vmem:[#allocation0] sm:$0x1] %v50_v15 }
  0x8e   :  { %62 = dma.vmem_to_hbm [thread:$0]  %s58_s29, 16, %s60_s1, [#allocation1]  }
  0x8f   :  { %105 = dma.done.wait [#allocation1], 16  }
  0x90   :  { %106 = vsyncadd [#allocation1], 4294967280 }
  0x91   :  { %65 = vsyncpa [#allocation1], 1 }

// kernel: squeeze.16
= control target key start
LH: loop header
LB: loop body
LE: loop exit
PB: predicated region body
PF: predicated region fallthrough
CT: control target
= control target key end

     0   :  { %s141_s0 = inlined_call_operand.vmem [shape: pred[1,8,4], index: 0, kind: input, shape index: {}]   ;;  %s142_s1 = inlined_call_operand.hbm [shape: pred[32], index: 1, kind: output, shape index: {}]  }
   0x1   :  { %v12_v0 = vld [vmem:[%s141_s0] sm:$0x3] }
   0x2   :  { %v13_v1 = vunpack.c.0.s8 %v12_v0 }
   0x3   :  { %2 = vsyncpa [#allocation1], 0  ;;  %s117_s0 = smov 28   ;;  %s118_s8 = smov 20   ;;  %vm19_vm0 = vcmask 31744   ;;  %vm25_vm1 = vcmask 261344  }
   0x4   :  { %17 = vst [vmem:[#allocation3] sm:$0xff] %v13_v1  ;;  %s119_s9 = smov 12   ;;  %s120_s10 = smov 24   ;;  %vm31_vm2 = vcmask 228544   ;;  %vm37_vm3 = vcmask 195744   ;;  %vm43_vm4 = vcmask 162944  }
   0x5   :  { %s121_s11 = smov 16   ;;  %s122_s12 = smov 8   ;;  %vm49_vm5 = vcmask 130144   ;;  %vm55_vm6 = vcmask 97344   ;;  %vm61_vm7 = vcmask 64544  }
   0x6   :  { %s123_s13 = smov 4   ;;  %s124_s14 = smov [#allocation0]  }
   0x7   :  { %s74_s15 = sshll.u32 %s124_s14, 4  ;;  %s76_s1 = sshll.u32 %s142_s1, 4  ;;  %s75_s15 = int_to_ptr.vmem [resolvable:$true] %s74_s15  ;;  %s77_s1 = int_to_ptr.hbm [resolvable:$true] %s76_s1 }
   0xb   :  { %v22_v2 = vld [vmem:[#allocation3 + $0x7] sm:$0x1]   ;;  %v34_v3 = vld [vmem:[#allocation3 + $0x5] sm:$0x1]   ;;  %v46_v4 = vld [vmem:[#allocation3 + $0x3] sm:$0x1]  }
   0xc   :  { %23 = vrot.lane.b32.xlu0 %v22_v2, %s117_s0  ;;  %35 = vrot.lane.b32.xlu1 %v34_v3, %s118_s8  ;;  %v28_v5 = vld [vmem:[#allocation3 + $0x6] sm:$0x1]   ;;  %v40_v6 = vld [vmem:[#allocation3 + $0x4] sm:$0x1]   ;;  %v52_v7 = vld [vmem:[#allocation3 + $0x2] sm:$0x1]  }
   0xd   :  { %47 = vrot.lane.b32.xlu2 %v46_v4, %s119_s9  ;;  %v58_v8 = vld [vmem:[#allocation3 + $0x1] sm:$0x1]   ;;  %v18_v9 = vld [vmem:[#allocation3] sm:$0x1]  }
   0xe   :  { %20 = vst.msk [vmem:[#allocation2] sm:$0x1] %vm19_vm0, %v18_v9  }
  0x14   :  { %29 = vrot.lane.b32.xlu0 %v28_v5, %s120_s10  ;;  %41 = vrot.lane.b32.xlu1 %v40_v6, %s121_s11 }
  0x15   :  { %53 = vrot.lane.b32.xlu2 %v52_v7, %s122_s12 }
  0x1c   :  { %59 = vrot.lane.b32.xlu0 %v58_v8, %s123_s13 }
  0x67   :  { %v48_v10 = vpop.permute.xlu2 %47  }
  0x6f   :  { %v54_v11 = vpop.permute.xlu2 %53  }
  0x7e   :  { %v24_v12 = vpop.permute.xlu0 %23   ;;  %v36_v13 = vpop.permute.xlu1 %35  }
  0x7f   :  { %26 = vst.msk [vmem:[#allocation2] sm:$0x1] %vm25_vm1, %v24_v12  }
  0x86   :  { %v30_v14 = vpop.permute.xlu0 %29   ;;  %v42_v15 = vpop.permute.xlu1 %41  }
  0x87   :  { %32 = vst.msk [vmem:[#allocation2] sm:$0x1] %vm31_vm2, %v30_v14  }
  0x88   :  { %38 = vst.msk [vmem:[#allocation2] sm:$0x1] %vm37_vm3, %v36_v13  }
  0x89   :  { %44 = vst.msk [vmem:[#allocation2] sm:$0x1] %vm43_vm4, %v42_v15  }
  0x8a   :  { %50 = vst.msk [vmem:[#allocation2] sm:$0x1] %vm49_vm5, %v48_v10  }
  0x8b   :  { %56 = vst.msk [vmem:[#allocation2] sm:$0x1] %vm55_vm6, %v54_v11  }
  0x8e   :  { %v60_v16 = vpop.permute.xlu0 %59  }
  0x8f   :  { %62 = vst.msk [vmem:[#allocation2] sm:$0x1] %vm61_vm7, %v60_v16  }
  0x96   :  { %v65_v17 = vld [vmem:[#allocation2] sm:$0xf] }
  0x97   :  { %v68_v18 = vpack.c.b16 0, %v65_v17 }
  0x99   :  { %v69_v19 = vpack.c.b8 0, %v68_v18 }
  0x9b   :  { %70 = vst [vmem:[#allocation0] sm:$0x1] %v69_v19 }
  0x9c   :  { %79 = dma.vmem_to_hbm [thread:$0]  %s75_s15, 16, %s77_s1, [#allocation1]  }
  0x9d   :  { %115 = dma.done.wait [#allocation1], 16  }
  0x9e   :  { %116 = vsyncadd [#allocation1], 4294967280 }
  0x9f   :  { %82 = vsyncpa [#allocation1], 1 }

// kernel: lt.30
= control target key start
LH: loop header
LB: loop body
LE: loop exit
PB: predicated region body
PF: predicated region fallthrough
CT: control target
= control target key end

     0   :  { %v5_v0 = vlaneseq  ;;  %s47_s0 = inlined_call_operand.vmem [shape: s32[2,8], index: 0, kind: input, shape index: {}]   ;;  %s48_s1 = inlined_call_operand.vmem [shape: s32[2,8,4], index: 1, kind: output, shape index: {}]  }
   0x1   :  { %v4_v2 = vld [vmem:[%s47_s0] ss:$0 sm:$0xff]  ;;  %v22_v3 = vld [vmem:[%s47_s0 + $0x1] ss:$0 sm:$0xff] }
   0x2   :  { %v6_v1 = vshrl.u32 %v5_v0, 7 }
   0x4   :  { %24 = vset.pattern.permute.xlu0 %v6_v1 }
   0xc   :  { %9 = vperm.xlu0 %24, %v4_v2  }
  0x14   :  { %18 = vperm.xlu0 %24, %v22_v3  }
  0x7e   :  { %v10_v4 = vpop.permute.xlu0 %9 }
  0x7f   :  { %11 = vst [vmem:[%s48_s1] sm:$0xff] %v10_v4 }
  0x86   :  { %v19_v5 = vpop.permute.xlu0 %18 }
  0x87   :  { %23 = vst [vmem:[%s48_s1 + $0x8] sm:$0xff] %v19_v5 }

// kernel: stage2_assigner_forward.1
= control target key start
LH: loop header
LB: loop body
LE: loop exit
PB: predicated region body
PF: predicated region fallthrough
CT: control target
= control target key end

     0   :  { %10 = vsyncpa [#allocation3], 0  ;;  %s889_s0 = inlined_call_operand.vmem [shape: f32[2,8,8], index: 0, kind: input, shape index: {}]   ;;  %s890_s1 = inlined_call_operand.vmem [shape: f32[2,4,128], index: 1, kind: input, shape index: {}]   ;;  %s891_s2 = inlined_call_operand.vmem [shape: s32[2,2,128], index: 2, kind: output, shape index: {0}]   ;;  %s892_s3 = inlined_call_operand.vmem [shape: s32[2,8,128], index: 3, kind: output, shape index: {1}]   ;;  %s893_s4 = inlined_call_operand.hbm [shape: f32[2,8,128], index: 4, kind: output, shape index: {2}]  }
   0x1   :  { %12 = vsyncpa [#allocation3 + $0x1], 0  ;;  %s754_s15 = smov 0   ;;  %s756_s16 = smov 0  }
   0x2   :  { %s758_s17 = smov 0   ;;  %s760_s18 = smov 0  }
   0x3 LB: > { %s775_s19 = sadd.s32 4294967295, %s722_s18   ;;  %s591_s20 = sadd.s32 4294967294, %s722_s18   ;;  %s722_s18 = sphi %s760_s18, %s899_s18   ;;  %s718_s17 = sphi %s758_s17, %s898_s17   ;;  %s714_s16 = sphi %s756_s16, %s897_s16   ;;  %s710_s15 = sphi %s754_s15, %s896_s15  }
   0x4   : > { %s779_s21 = sadd.s32 1, %s722_s18   ;;  %s129_s22 = sadd.s32 1, %s718_s17 }
   0x5   : > { %s126_s23 = ssub.s32 %s722_s18, %s779_s21  ;;  %p139_p0 = scmp.ne.s32.totalorder %s718_s17, %s714_s16 }
   0x6   : > { %p127_p1 = scmp.eq.s32.totalorder %s126_s23, 0  ;;  %p140_p2 = scmp.eq.s32.totalorder %s775_s19, 1 }
   0x7   : > { %p145_p3 = scmp.ne.s32.totalorder %s714_s16, %s710_s15  ;;  %p146_p4 = scmp.eq.s32.totalorder %s591_s20, 1 }
   0x8   : > { %s790_s24 = scalar_select %p127_p1, %s718_s17, %s129_s22  }
   0x9   : > { %p792_p5 = por %p140_p2, %p139_p0  ;;  %p796_p6 = por %p146_p4, %p145_p3 }
   0xa   : > { %p594_p7 = scmp.ge.s32.totalorder %s722_s18, 1  ;;  %p178_p8 = scmp.lt.s32.totalorder %s722_s18, 3 }
   0xc   : > { %p179_p9 = pnand %p594_p7, %p178_p8 }
   0xd   : > { %p215_p10 = scmp.lt.s32.totalorder (!%p179_p9), %s775_s19, 1  ;;  %s724_s6 = smov (!%p179_p9), 126  }
   0xe   : > { %182 = sbr.rel (%p179_p9) target bundleno = 1406 (0x57e), region = 28  ;;  %s727_s10 = smov (!%p179_p9), 127  }
   0xf   : > { %s212_s20 = sand.u32 (!%p179_p9), 1, %s714_s16   ;;  %s680_s29 = scalar_lea.hbm (!%p179_p9), %s893_s4, 16 }
  0x10   : > { %s827_s22 = sshll.u32 (!%p179_p9), %s212_s20, 3  ;;  %s451_s12 = scalar_lea.sflag (!%p179_p9), [#allocation3], %s212_s20 }
  0x11   : > { %s214_s23 = scalar_lea.vmem (!%p179_p9), [#allocation2], %s827_s22 }
  0x13   : > { %s804_s27 = scalar_select %p215_p10, %s775_s19, 1  ;;  %v725_v2 = vmov 1   ;;  %v726_v3 = vmov 0   ;;  %v728_v8 = vmov 4   ;;  %v312_v53 = vlaneseq }
  0x14   : > { %654 = vset.pattern.permute.xlu2 %v725_v2  ;;  %653 = vset.pattern.permute.xlu1 %v726_v3  ;;  %vm380_vm11 = vcmask 7168  }
  0x15   : > { %s596_s28 = sshll.u32 %s804_s27, 3  ;;  %655 = vset.pattern.permute.xlu0 %v726_v3  ;;  %s597_s11 = sshll.u32 %s804_s27, 2  ;;  %v313_v57 = vshrl.u32 %v312_v53, 7  ;;  %v833_v58 = vand.u32 127, %v312_v53 }
  0x16   : > { %s218_s5 = scalar_lea.vmem %s889_s0, %s596_s28  ;;  %s813_s9 = scalar_lea.vmem %s892_s3, %s596_s28 }
  0x17   : > { %v231_v0 = vld [vmem:[%s218_s5] sm:$0xff]  ;;  %377 = vst [vmem:[%s813_s9] sm:$0xff] %v726_v3  ;;  %s222_s14 = scalar_lea.vmem %s890_s1, %s597_s11  ;;  %v327_v62 = vsub.s32 7, %v313_v57  ;;  %s598_s28 = sshll.u32 %s804_s27, 1 }
  0x18   : > { %v234_v1 = vmul.f32 0.5, %v231_v0  ;;  %vm233_vm0 = vcmp.gt.f32.partialorder %v231_v0, 0.5  ;;  %v232_v12 = vld [vmem:[%s222_s14] sm:$0xf]  ;;  %s840_s5 = scalar_lea.vmem %s891_s2, %s598_s28  ;;  %s601_s27 = sshll.u32 %s775_s19, 3 }
  0x19   : > { %v317_v9 = vsel %vm233_vm0, 1, %v726_v3  ;;  %v241_v13 = vmul.f32 0.5, %v232_v12  ;;  %s467_s8 = scalar_lea.hbm %s893_s4, %s601_s27 }
  0x1a   : > { %236 = vrot.lane.b32.xlu0 %v234_v1, %s724_s6  ;;  %s471_s11 = sshll.u32 %s467_s8, 4  ;;  %s472_s11 = int_to_ptr.hbm [resolvable:$true] %s471_s11 }
  0x1b   : > { %v243_v16 = vrot.slane %v241_v13, 2  ;;  %s674_s13 = sshra.s32 %s472_s11, 4  ;;  %s675_s13 = int_to_ptr.hbm [resolvable:$true] %s674_s13 }
  0x1c   : > { %s676_s14 = scalar_lea.hbm %s675_s13, 8  ;;  %p681_p0 = scmp.lt.s32.totalorder %s675_s13, %s893_s4 }
  0x1d   : > { %v246_v17 = vadd.f32 %v243_v16, %v232_v12  ;;  %v245_v18 = vsub.f32 %v232_v12, %v243_v16  ;;  %p677_p11 = scmp.ne.s32.totalorder %s675_s13, %s676_s14  ;;  %p682_p1 = scmp.lt.s32.totalorder %s680_s29, %s676_s14 }
  0x1f   : > { %v270_v19 = vperm.slane %v245_v18, 0  ;;  %v253_v20 = vsub.f32 %v246_v17, %v245_v18  ;;  %v284_v22 = vperm.slane %v245_v18, 1  ;;  %v263_v23 = vperm.slane %v246_v17, 0  ;;  %p678_p12 = pnand %p677_p11, %p792_p5  ;;  %p683_p2 = por %p682_p1, %p681_p0 }
  0x20   : > { %v278_v25 = vperm.slane %v246_v17, 1 }
  0x21   : > { %v255_v27 = vrot.slane %v253_v20, 1  ;;  %p679_p13 = pneg %p678_p12 }
  0x23   : > { %v257_v32 = vmul.f32 %v255_v27, %v253_v20  ;;  %p684_p3 = pnand %p683_p2, %p679_p13 }
  0x25   : > { %v294_v35 = vperm.slane %v257_v32, 0 }
  0x8c   : > { %v237_v4 = vpop.permute.xlu0 %236 }
  0x8d   : > { %v239_v5 = vsub.f32 %v231_v0, %v237_v4  ;;  %v240_v6 = vadd.f32 %v237_v4, %v231_v0  ;;  %v342_v0 = vsub.s32 127, %v833_v58 }
  0x8f   : > { %275 = vperm.xlu2 %654, %v240_v6   ;;  %260 = vperm.xlu1 %653, %v240_v6   ;;  %v247_v7 = vsub.f32 %v240_v6, %v239_v5 }
  0x91   : > { %249 = vrot.lane.b32.xlu0 %v247_v7, %s727_s10  ;;  %s469_s10 = sshll.u32 %s214_s23, 4  ;;  %s470_s10 = int_to_ptr.vmem [resolvable:$true] %s469_s10 }
  0x97   : > { %281 = vperm.xlu2 %654, %v239_v5   ;;  %267 = vperm.xlu1 %653, %v239_v5  }
  0x9f   : > { %656 = vset.pattern.permute.xlu1 %v728_v8 }
  0xa0   : > { %319 = vperm.xlu1 %656, %v317_v9  }
  0xe9   : > { %v276_v15 = vpop.permute.xlu2 %275 }
  0xea   : > { %v279_v30 = vmin.f32 %v276_v15, %v278_v25 }
  0xf1   : > { %v282_v24 = vpop.permute.xlu2 %281 }
  0xf2   : > { %v285_v28 = vmax.f32 %v282_v24, %v284_v22 }
  0xf4   : > { %v286_v33 = vsub.f32 %v279_v30, %v285_v28 }
  0xf6   : > { %v287_v36 = vmax.f32 %v286_v33, 0.0 }
 0x101   : > { %v261_v14 = vpop.permute.xlu1 %260 }
 0x102   : > { %v264_v29 = vmin.f32 %v261_v14, %v263_v23 }
 0x103   : > { %v250_v10 = vpop.permute.xlu0 %249 }
 0x104   : > { %v252_v11 = vmul.f32 %v250_v10, %v247_v7 }
 0x106   : > { %291 = vperm.xlu0 %655, %v252_v11  }
 0x109   : > { %v268_v21 = vpop.permute.xlu1 %267 }
 0x10a   : > { %v271_v26 = vmax.f32 %v268_v21, %v270_v19 }
 0x10c   : > { %v272_v31 = vsub.f32 %v264_v29, %v271_v26 }
 0x10e   : > { %657 = vset.pattern.permute.xlu0 %v728_v8  ;;  %v273_v34 = vmax.f32 %v272_v31, 0.0 }
 0x110   : > { %v288_v38 = vmul.f32 %v287_v36, %v273_v34 }
 0x112   : > { %v320_v49 = vpop.permute.xlu1 %319 }
 0x113   : > { %vm321_vm5 = vcmp.eq.s32.totalorder %v320_v49, 1 }
 0x178   : > { %v292_v37 = vpop.permute.xlu0 %291 }
 0x179   : > { %v295_v39 = vadd.f32 %v294_v35, %v292_v37 }
 0x17b   : > { %v296_v40 = vsub.f32 %v295_v39, %v288_v38 }
 0x17d   : > { %v297_v41 = vmax.f32 %v296_v40, 1e-09 }
 0x17f   : > { %658 = vrcp.f32 %v297_v41  ;;  %v309_v45 = vand.u32 2147483648, %v297_v41  ;;  %v307_v47 = vand.u32 2147483647, %v297_v41  ;;  %vm303_vm2 = vweird.f32 %v297_v41 }
 0x181   : > { %v310_v50 = vor.u32 1.1754944e-38, %v309_v45  ;;  %vm308_vm4 = vcmp.eq.f32.partialorder %v307_v47, 8.507059e+37 }
 0x185   : > { %v659_v42 = vpop.eup %658 }
 0x186   : > { %v299_v43 = vmul.f32 %v659_v42, %v297_v41  ;;  %vm304_vm1 = vweird.f32 %v659_v42 }
 0x187   : > { %vm305_vm3 = vmor %vm303_vm2, %vm304_vm1 }
 0x188   : > { %v300_v44 = vsub.f32 1.0, %v299_v43 }
 0x18a   : > { %v301_v46 = vmul.f32 %v659_v42, %v300_v44 }
 0x18c   : > { %v302_v48 = vadd.f32 %v659_v42, %v301_v46 }
 0x18e   : > { %v306_v51 = vsel %vm305_vm3, %v659_v42, %v302_v48 }
 0x18f   : > { %v311_v52 = vsel %vm308_vm4, %v310_v50, %v306_v51 }
 0x190   : > { %v316_v54 = vmul.f32 %v311_v52, %v288_v38 }
 0x192   : > { %v322_v55 = vsel %vm321_vm5, %v316_v54, -1.0 }
 0x193   : > { %323 = vst [vmem:[%s214_s23] sm:$0xff] %v322_v55  ;;  %v324_v56 = vmul.f32 8388608.0, %v322_v55 }
 0x195   : > { %vm604_vm6 = vcmp.lt.s32.totalorder %v324_v56, 0  ;;  %v605_v59 = vceil.f32 %v324_v56  ;;  %v606_v60 = vfloor.f32 %v324_v56 }
 0x197   : > { %v607_v61 = vsel %vm604_vm6, %v605_v59, %v606_v60  ;;  %vm400_vm6 = vcmask 15368  }
 0x198   : > { %v608_v63 = vcvt.f32.s32 %v607_v61 }
 0x19a   : > { %v326_v1 = vmul.u32 8, %v608_v63  ;;  %v341_v2 = vmul.u32 128, %v608_v63 }
 0x19c   : > { %v328_v4 = vadd.s32 %v327_v62, %v326_v1  ;;  %v343_v5 = vadd.s32 %v342_v0, %v341_v2 }
 0x19e   : > { %v329_v6 = vrot.slane %v328_v4, 4  ;;  %v345_v7 = vshra.s32 %v343_v5, 16  ;;  %v344_v16 = vand.u32 65535, %v343_v5 }
 0x1a0   : > { %vm330_vm7 = vcmp.gt.s32.totalorder %v328_v4, %v329_v6  ;;  %v347_v8 = vcvt.s32.f32 %v345_v7  ;;  %v346_v18 = vcvt.s32.f32 %v344_v16 }
 0x1a1   : > { %v331_v9 = vsel %vm330_vm7, %v328_v4, %v329_v6 }
 0x1a2   : > { %v332_v10 = vrot.slane %v331_v9, 2  ;;  %348 = vmax.xlane.f32.xlu2 %v347_v8 }
 0x1a4   : > { %vm333_vm8 = vcmp.gt.s32.totalorder %v331_v9, %v332_v10 }
 0x1a5   : > { %v334_v11 = vsel %vm333_vm8, %v331_v9, %v332_v10 }
 0x1a6   : > { %v335_v12 = vrot.slane %v334_v11, 1 }
 0x1a8   : > { %vm336_vm9 = vcmp.gt.s32.totalorder %v334_v11, %v335_v12 }
 0x1a9   : > { %v337_v13 = vsel %vm336_vm9, %v334_v11, %v335_v12  ;;  %vm420_vm9 = vcmask 23568  }
 0x1aa   : > { %v338_v14 = vand.u32 7, %v337_v13  ;;  %v340_v36 = vshra.s32 %v337_v13, 3 }
 0x1ac   : > { %v339_v15 = vsub.s32 7, %v338_v14  ;;  %vm372_vm3 = vcmp.ge.s32.totalorder %v340_v36, 5033164 }
 0x1ae   : > { %375 = vst [vmem:[%s840_s5] sm:$0x1] %v339_v15 }
 0x215   : > { %v349_v17 = vpop.xlane.xlu2 %348 }
 0x216   : > { %vm350_vm10 = vcmp.eq.f32.partialorder %v347_v8, %v349_v17  ;;  %v355_v20 = vcvt.f32.s32 %v349_v17 }
 0x217   : > { %v351_v19 = vsel %vm350_vm10, %v346_v18, -inf }
 0x218   : > { %352 = vmax.xlane.f32.xlu1 %v351_v19  ;;  %v356_v22 = vshll.u32 %v355_v20, 16 }
 0x28b   : > { %v353_v21 = vpop.xlane.xlu1 %352 }
 0x28c   : > { %v354_v23 = vcvt.f32.s32 %v353_v21 }
 0x28e   : > { %v357_v24 = vadd.s32 %v356_v22, %v354_v23 }
 0x290   : > { %v358_v25 = vshra.s32 %v357_v24, 7  ;;  %v378_v26 = vand.u32 127, %v357_v24 }
 0x292   : > { %vm359_vm12 = vcmp.eq.s32.totalorder %v608_v63, %v358_v25  ;;  %v379_v27 = vsub.s32 127, %v378_v26 }
 0x293   : > { %vm360_vm13 = vmand %vm359_vm12, %vm321_vm5 }
 0x294   : > { %v361_v28 = vsel %vm360_vm13, 1, %v726_v3  ;;  %381 = vst.msk [vmem:[%s813_s9] sm:$0xff] %vm380_vm11, %v379_v27  ;;  %vm382_vm14 = vcmp.eq.s32.totalorder %v833_v58, %v379_v27 }
 0x295   : > { %v362_v29 = vrot.slane %v361_v28, 4  ;;  %v383_v30 = vsel %vm382_vm14, 2147483649, %v343_v5 }
 0x296   : > { %v385_v31 = vshra.s32 %v383_v30, 16  ;;  %v384_v40 = vand.u32 65535, %v383_v30 }
 0x297   : > { %vm363_vm15 = vcmp.gt.s32.totalorder %v361_v28, %v362_v29 }
 0x298   : > { %v364_v32 = vsel %vm363_vm15, %v361_v28, %v362_v29  ;;  %v387_v33 = vcvt.s32.f32 %v385_v31  ;;  %v386_v42 = vcvt.s32.f32 %v384_v40 }
 0x299   : > { %v365_v34 = vrot.slane %v364_v32, 2 }
 0x29a   : > { %388 = vmax.xlane.f32.xlu0 %v387_v33 }
 0x29b   : > { %vm366_vm0 = vcmp.gt.s32.totalorder %v364_v32, %v365_v34 }
 0x29c   : > { %v367_v35 = vsel %vm366_vm0, %v364_v32, %v365_v34 }
 0x29d   : > { %v368_v37 = vrot.slane %v367_v35, 1 }
 0x29f   : > { %vm369_vm1 = vcmp.gt.s32.totalorder %v367_v35, %v368_v37 }
 0x2a0   : > { %v370_v38 = vsel %vm369_vm1, %v367_v35, %v368_v37 }
 0x2a1   : > { %vm371_vm2 = vcmp.gt.s32.totalorder %v370_v38, 0 }
 0x2a2   : > { %vm373_vm4 = vmor %vm372_vm3, %vm371_vm2 }
 0x2a3   : > { %v374_v39 = vsel %vm373_vm4, 1, %v726_v3 }
 0x2a4   : > { %376 = vst [vmem:[%s840_s5 + $0x1] sm:$0x1] %v374_v39 }
 0x30d   : > { %v389_v41 = vpop.xlane.xlu0 %388 }
 0x30e   : > { %vm390_vm5 = vcmp.eq.f32.partialorder %v387_v33, %v389_v41  ;;  %v395_v44 = vcvt.f32.s32 %v389_v41 }
 0x30f   : > { %v391_v43 = vsel %vm390_vm5, %v386_v42, -inf }
 0x310   : > { %392 = vmax.xlane.f32.xlu2 %v391_v43  ;;  %v396_v46 = vshll.u32 %v395_v44, 16 }
 0x383   : > { %v393_v45 = vpop.xlane.xlu2 %392 }
 0x384   : > { %v394_v47 = vcvt.f32.s32 %v393_v45 }
 0x386   : > { %v397_v48 = vadd.s32 %v396_v46, %v394_v47 }
 0x388   : > { %v398_v49 = vand.u32 127, %v397_v48 }
 0x38a   : > { %v399_v50 = vsub.s32 127, %v398_v49 }
 0x38c   : > { %401 = vst.msk [vmem:[%s813_s9] sm:$0xff] %vm400_vm6, %v399_v50  ;;  %vm402_vm7 = vcmp.eq.s32.totalorder %v833_v58, %v399_v50 }
 0x38d   : > { %v403_v3 = vsel %vm402_vm7, 2147483649, %v383_v30 }
 0x38e   : > { %v405_v51 = vshra.s32 %v403_v3, 16  ;;  %v404_v53 = vand.u32 65535, %v403_v3 }
 0x390   : > { %v407_v52 = vcvt.s32.f32 %v405_v51  ;;  %v406_v55 = vcvt.s32.f32 %v404_v53 }
 0x392   : > { %408 = vmax.xlane.f32.xlu2 %v407_v52 }
 0x405   : > { %v409_v54 = vpop.xlane.xlu2 %408 }
 0x406   : > { %vm410_vm8 = vcmp.eq.f32.partialorder %v407_v52, %v409_v54  ;;  %v415_v57 = vcvt.f32.s32 %v409_v54 }
 0x407   : > { %v411_v56 = vsel %vm410_vm8, %v406_v55, -inf }
 0x408   : > { %412 = vmax.xlane.f32.xlu1 %v411_v56  ;;  %v416_v60 = vshll.u32 %v415_v57, 16 }
 0x47b   : > { %v413_v59 = vpop.xlane.xlu1 %412 }
 0x47c   : > { %v414_v61 = vcvt.f32.s32 %v413_v59 }
 0x47e   : > { %v417_v62 = vadd.s32 %v416_v60, %v414_v61 }
 0x480   : > { %v418_v63 = vand.u32 127, %v417_v62 }
 0x482   : > { %v419_v0 = vsub.s32 127, %v418_v63 }
 0x484   : > { %421 = vst.msk [vmem:[%s813_s9] sm:$0xff] %vm420_vm9, %v419_v0  ;;  %vm422_vm10 = vcmp.eq.s32.totalorder %v833_v58, %v419_v0 }
 0x485   : > { %v423_v1 = vsel %vm422_vm10, 2147483649, %v403_v3 }
 0x486   : > { %v425_v2 = vshra.s32 %v423_v1, 16  ;;  %v424_v5 = vand.u32 65535, %v423_v1 }
 0x488   : > { %v427_v4 = vcvt.s32.f32 %v425_v2  ;;  %v426_v7 = vcvt.s32.f32 %v424_v5 }
 0x48a   : > { %428 = vmax.xlane.f32.xlu2 %v427_v4 }
 0x4fd   : > { %v429_v6 = vpop.xlane.xlu2 %428 }
 0x4fe   : > { %687 = shalt.err (!%p684_p3)
}
 0x4ff   : > { %609 = dma.vmem_to_hbm [thread:$0]  (%p792_p5), %s470_s10, 128, %s472_s11, %s451_s12   ;;  %vm430_vm11 = vcmp.eq.f32.partialorder %v427_v4, %v429_v6  ;;  %v435_v8 = vcvt.f32.s32 %v429_v6  ;;  %vm440_vm12 = vcmask 31768  }
 0x500   : > { %v431_v58 = vsel %vm430_vm11, %v426_v7, -inf }
 0x501   : > { %432 = vmax.xlane.f32.xlu0 %v431_v58  ;;  %v436_v10 = vshll.u32 %v435_v8, 16 }
 0x574   : > { %v433_v9 = vpop.xlane.xlu0 %432 }
 0x575   : > { %v434_v11 = vcvt.f32.s32 %v433_v9 }
 0x577   : > { %v437_v12 = vadd.s32 %v436_v10, %v434_v11 }
 0x579   : > { %v438_v13 = vand.u32 127, %v437_v12 }
 0x57b   : > { %v439_v14 = vsub.s32 127, %v438_v13 }
 0x57d   : > { %441 = vst.msk [vmem:[%s813_s9] sm:$0xff] %vm440_vm12, %v439_v14 }
 0x57e PF: > { %p615_p4 = scmp.ge.s32.totalorder %s722_s18, 2  ;;  %s497_s25 = sand.u32 1, %s710_s15  }
 0x57f   : > { %s498_s20 = scalar_lea.sflag [#allocation3], %s497_s25 }
 0x580   : > { %p612_p5 = pnand %p615_p4, %p796_p6 }
 0x582   : > { %p613_p7 = pneg %p612_p5 }
 0x584   : > { %705 = dma.done.wait (%p613_p7), %s498_s20, 128  }
 0x585   : > { %707 = vsyncadd (%p613_p7), %s498_s20, 4294967168  ;;  %p15_p8 = scmp.ge.s32.totalorder %s779_s21, 4   ;;  %s896_s15 = smov %s714_s16 }
 0x586   : > { %s897_s16 = smov %s718_s17  ;;  %s898_s17 = smov %s790_s24 }
 0x587   : > { %s899_s18 = smov %s779_s21  ;;  %17 = sbr.rel (!%p15_p8) target bundleno = 3 (0x3), region = 90 }
 0x58c   :  { %504 = vsyncpa [#allocation3], 1 }
 0x58d   :  { %506 = vsyncpa [#allocation3 + $0x1], 1 }

</bundles_post_ra>
